<compile_context>
chip_gen: v7x
topology: tpu7x:2x2x1
jax: 0.10.0
libtpu: 0.0.40
codegen_flags: <defaults>
</compile_context>

<pallas_src>
import jax
import jax.numpy as jnp
from jax.experimental import pallas as pl
from jax.experimental.pallas import tpu as pltpu


def _transpose_tile_kernel(x_ref, o_ref):
    # x_ref block: (tS, tD), o_ref block: (tD, tS) -- 2-D transpose in VMEM
    # (XLU vxpose path; hides under HBM DMA on v5e/v6e).
    # TODO(synk): if the XLU slot binds on v7x (3.2 TB/s per TC), route this
    # through an MXU identity-matmul transpose instead.
    o_ref[...] = x_ref[...].T


_FULL_SLAB_BUDGET = 2 * 1024 * 1024    # take whole (S, D) per step if <= this
_SMALL_BYPASS_BYTES = 256 * 1024       # below this, let XLA do it
_MIN_TILE_DIM = 128                    # below this, stores are masked partial vregs
_VMEM_HEADROOM = 4 * 1024 * 1024
_VMEM_CAP = 40 * 1024 * 1024           # stay well under v7x's 64 MiB physical VMEM


def _tile_targets(itemsize: int):
    # Byte-based target: ~2 MiB per tile so each grid step moves ~4 MiB
    # (input tile + output tile) regardless of dtype.
    if itemsize >= 4:
        return 1024, 512               # f32: 1024 x 512  = 2 MiB
    return 1024, 1024                  # bf16/f16: 1024 x 1024 = 2 MiB


def _pick_tile(n: int, target: int) -> int:
    # Full dim when small (legal via the "equals full array dim" exemption of
    # the (8,128) rule); otherwise a lane-dense multiple-of-128 tile.
    return n if n <= target else target


def _vmem_limit(tile_bytes: int) -> int:
    # Double-buffered input tile + double-buffered output tile + headroom.
    working = 2 * 2 * tile_bytes
    return max(8 * 1024 * 1024, min(_VMEM_CAP, working + _VMEM_HEADROOM))


def _transpose_full_slab(x: jax.Array) -> jax.Array:
    """(B, S, D) -> (B, D, S); one whole slab per grid step, B pipeline stages."""
    B, S, D = x.shape
    tile_bytes = S * D * jnp.dtype(x.dtype).itemsize
    return pl.pallas_call(
        _transpose_tile_kernel,
        out_shape=jax.ShapeDtypeStruct((B, D, S), x.dtype),
        grid_spec=pltpu.PrefetchScalarGridSpec(
            num_scalar_prefetch=0,
            grid=(B,),
            in_specs=[pl.BlockSpec((pl.Squeezed(), S, D), lambda b: (b, 0, 0))],
            out_specs=pl.BlockSpec((pl.Squeezed(), D, S), lambda b: (b, 0, 0)),
        ),
        compiler_params=pltpu.CompilerParams(
            dimension_semantics=("parallel",),
            vmem_limit_bytes=_vmem_limit(tile_bytes),
        ),
    )(x)


def _transpose_tiled(x: jax.Array) -> jax.Array:
    """(B, S, D) -> (B, D, S) with ~2 MiB (tS, tD) tiles.

    Grid is (nS, nD, B) so the leading grid axis is the large S-tile axis even
    when B == 1 (helps the v7x two-TensorCore split); edge tiles are handled
    by Pallas masking.
    """
    B, S, D = x.shape
    itemsize = jnp.dtype(x.dtype).itemsize
    tgt_s, tgt_d = _tile_targets(itemsize)
    tS = _pick_tile(S, tgt_s)
    tD = _pick_tile(D, tgt_d)
    grid = (pl.cdiv(S, tS), pl.cdiv(D, tD), B)
    tile_bytes = tS * tD * itemsize
    return pl.pallas_call(
        _transpose_tile_kernel,
        out_shape=jax.ShapeDtypeStruct((B, D, S), x.dtype),
        grid_spec=pltpu.PrefetchScalarGridSpec(
            num_scalar_prefetch=0,
            grid=grid,
            in_specs=[
                pl.BlockSpec((pl.Squeezed(), tS, tD), lambda i, j, b: (b, i, j))
            ],
            out_specs=pl.BlockSpec(
                (pl.Squeezed(), tD, tS), lambda i, j, b: (b, j, i)
            ),
        ),
        compiler_params=pltpu.CompilerParams(
            dimension_semantics=("parallel", "parallel", "parallel"),
            vmem_limit_bytes=_vmem_limit(tile_bytes),
        ),
    )(x)


def pallas_transpose_last_two(x: jax.Array) -> jax.Array:
    """(B, S, D) -> (B, D, S); the axis swap happens on-chip in the kernel."""
    assert x.ndim == 3
    B, S, D = x.shape
    itemsize = jnp.dtype(x.dtype).itemsize
    total_bytes = B * S * D * itemsize

    # Bypasses: packed sub-16-bit dtypes (packed-tile XLU transpose untested),
    # tiny tensors (launch + step overhead dominates a pure copy), or dims so
    # small every store is a masked partial-vreg vst. XLA does these for free.
    if (
        itemsize < 2
        or total_bytes < _SMALL_BYPASS_BYTES
        or S < _MIN_TILE_DIM
        or D < _MIN_TILE_DIM
    ):
        return jnp.swapaxes(x, 1, 2)

    if S * D * itemsize <= _FULL_SLAB_BUDGET:
        return _transpose_full_slab(x)
    return _transpose_tiled(x)


class Transpose:
    """Mirror of the PyTorch module: holds (dim1, dim2), applies the swap."""

    def __init__(self, dim1: int, dim2: int):
        self.dim1 = dim1
        self.dim2 = dim2

    def __call__(self, x: jax.Array) -> jax.Array:
        d1 = self.dim1 % x.ndim
        d2 = self.dim2 % x.ndim
        if d1 == d2:
            return x
        lo, hi = sorted((d1, d2))
        # Hot path: swapping the trailing two axes (ViT's (1, 2) on (B, S, D)).
        if x.ndim >= 2 and (lo, hi) == (x.ndim - 2, x.ndim - 1):
            lead = x.shape[:-2]
            S, D = x.shape[-2], x.shape[-1]
            batch = 1
            for n in lead:
                batch *= n
            y = pallas_transpose_last_two(x.reshape(batch, S, D))
            return y.reshape(*lead, D, S)
        # TODO(synk): general (dim1, dim2) over non-trailing axes falls back to
        # plain JAX swapaxes; only the trailing-axes case goes through Pallas.
        return jnp.swapaxes(x, d1, d2)


if __name__ == "__main__":
    key = jax.random.PRNGKey(0)
    mod = Transpose(1, 2)

    # 1) ViT-style tiny token tensor (batch=2, seq=8, hidden=32) ->
    #    small-tensor bypass path; correctness + shape/dtype check.
    x1 = jax.random.normal(key, (2, 8, 32), dtype=jnp.float32)
    y1 = jax.block_until_ready(mod(x1))
    assert y1.shape == (2, 32, 8)
    assert y1.dtype == x1.dtype
    assert jnp.array_equal(y1, jnp.swapaxes(x1, 1, 2))

    # 2) ViT hidden-state-like shape -> Pallas full-slab path
    #    (per-batch slab = 256*768*4 B = 768 KiB <= 2 MiB budget).
    x2 = jax.random.normal(jax.random.PRNGKey(0), (2, 256, 768), dtype=jnp.float32)
    y2 = jax.block_until_ready(mod(x2))
    assert y2.shape == (2, 768, 256)
    assert jnp.array_equal(y2, jnp.swapaxes(x2, 1, 2))

    # 3) Larger slab -> tiled Pallas path (tS=1024, tD=512) with masked edge
    #    tiles along both axes (1152 = 1024 + 128, 520 = 512 + 8).
    x3 = jax.random.normal(jax.random.PRNGKey(0), (1, 1152, 520), dtype=jnp.float32)
    y3 = jax.block_until_ready(mod(x3))
    assert y3.shape == (1, 520, 1152)
    assert jnp.array_equal(y3, jnp.swapaxes(x3, 1, 2))

    # 4) bf16 through the Pallas full-slab path.
    x4 = x2.astype(jnp.bfloat16)
    y4 = jax.block_until_ready(mod(x4))
    assert y4.dtype == jnp.bfloat16
    assert jnp.array_equal(y4, jnp.swapaxes(x4, 1, 2))

    print("KERNEL_OK")
</pallas_src>

<mosaic_0001>
module attributes {stable_mosaic.version = 11 : i64} {
  func.func @_transpose_tile_kernel(%arg0: i32, %arg1: memref<1x256x768xf32, #tpu.memory_space<vmem>>, %arg2: memref<1x768x256xf32, #tpu.memory_space<vmem>>) attributes {dimension_semantics = [#tpu.dimension_semantics<parallel>], iteration_bounds = array<i64: 2>, scalar_prefetch = 0 : i64, scratch_operands = 0 : i64, tpu.core_type = #tpu.core_type<tc>, window_params = [{transform_indices = @transform_0, window_bounds = array<i64: 1, 256, 768>}, {transform_indices = @transform_1, window_bounds = array<i64: 1, 768, 256>}]} {
    %c0 = arith.constant 0 : index
    %c0_0 = arith.constant 0 : index
    %c0_1 = arith.constant 0 : index
    %0 = vector.load %arg1[%c0, %c0_0, %c0_1] : memref<1x256x768xf32, #tpu.memory_space<vmem>>, vector<1x256x768xf32>
    %1 = vector.shape_cast %0 : vector<1x256x768xf32> to vector<256x768xf32>
    %2 = tpu.transpose %1, [1, 0] : vector<256x768xf32> -> vector<768x256xf32>
    %c0_2 = arith.constant 0 : index
    %c0_3 = arith.constant 0 : index
    %c0_4 = arith.constant 0 : index
    %3 = vector.load %arg2[%c0_2, %c0_3, %c0_4] : memref<1x768x256xf32, #tpu.memory_space<vmem>>, vector<1x768x256xf32>
    %4 = vector.shape_cast %3 : vector<1x768x256xf32> to vector<768x256xf32>
    %5 = vector.shape_cast %2 : vector<768x256xf32> to vector<1x768x256xf32>
    tpu.vector_store %arg2[%c0_2, %c0_3, %c0_4], %5 {strides = array<i32>} : memref<1x768x256xf32, #tpu.memory_space<vmem>>, vector<1x768x256xf32>,
    return
  }
  func.func @transform_0(%arg0: i32) -> (i32, i32, i32) {
    %c0_i32 = arith.constant 0 : i32
    %c0_i32_0 = arith.constant 0 : i32
    %c0_i32_1 = arith.constant 0 : i32
    return %arg0, %c0_i32, %c0_i32_0 : i32, i32, i32
  }
  func.func @transform_1(%arg0: i32) -> (i32, i32, i32) {
    %c0_i32 = arith.constant 0 : i32
    %c0_i32_0 = arith.constant 0 : i32
    %c0_i32_1 = arith.constant 0 : i32
    return %arg0, %c0_i32, %c0_i32_0 : i32, i32, i32
  }
}

</mosaic_0001>

<bundles_post_ra>
// kernel: tpu_custom_call.1
= control target key start
LH: loop header
LB: loop body
LE: loop exit
PB: predicated region body
PF: predicated region fallthrough
CT: control target
= control target key end

     0   :  { %6 = vsyncpa [#allocation3], 0  ;;  %s1715_s0 = inlined_call_operand.hbm [shape: f32[2,256,768], index: 0, kind: input, shape index: {}]   ;;  %s1716_s1 = inlined_call_operand.hbm [shape: f32[2,768,256], index: 1, kind: output, shape index: {}]  }
   0x1   :  { %8 = vsyncpa [#allocation3 + $0x1], 0 }
   0x2   :  { %9 = vsyncpa [#allocation4], 0 }
   0x3   :  { %11 = vsyncpa [#allocation4 + $0x1], 0  ;;  %s1166_s6 = smov 0   ;;  %s1168_s7 = smov 0  }
   0x4   :  { %s1170_s8 = smov 0   ;;  %s1172_s9 = smov 0  }
   0x5 LB: > { %s1187_s10 = sadd.s32 4294967295, %s1148_s9   ;;  %s990_s11 = sadd.s32 4294967294, %s1148_s9   ;;  %s1148_s9 = sphi %s1172_s9, %s1728_s9   ;;  %s1144_s8 = sphi %s1170_s8, %s1727_s8   ;;  %s1140_s7 = sphi %s1168_s7, %s1726_s7   ;;  %s1136_s6 = sphi %s1166_s6, %s1725_s6  }
   0x6   : > { %s1191_s12 = sadd.s32 1, %s1148_s9   ;;  %s24_s13 = sadd.s32 1, %s1144_s8 }
   0x7   : > { %s21_s14 = ssub.s32 %s1148_s9, %s1191_s12  ;;  %p31_p0 = scmp.ne.s32.totalorder %s1144_s8, %s1140_s7 }
   0x8   : > { %p22_p1 = scmp.eq.s32.totalorder %s21_s14, 0  ;;  %p32_p2 = scmp.eq.s32.totalorder %s1148_s9, 0 }
   0x9   : > { %p37_p3 = scmp.ne.s32.totalorder %s1140_s7, %s1136_s6  ;;  %p38_p4 = scmp.eq.s32.totalorder %s1187_s10, 0 }
   0xa   : > { %s1203_s15 = scalar_select %p22_p1, %s1144_s8, %s24_s13  }
   0xb   : > { %p33_p5 = por %p32_p2, %p31_p0  ;;  %p1205_p6 = por %p38_p4, %p37_p3 }
   0xc   : > { %p61_p7 = scmp.eq.s32.totalorder %s1187_s10, 1  ;;  %p67_p8 = scmp.eq.s32.totalorder %s990_s11, 1 }
   0xd   : > { %p1014_p10 = scmp.lt.s32.totalorder %s1148_s9, 2  ;;  %s87_s19 = sand.u32 1, %s1144_s8  }
   0xe   : > { %p1212_p11 = por %p61_p7, %p31_p0  ;;  %p1216_p12 = por %p67_p8, %p37_p3 }
   0xf   : > { %s999_s20 = smul.u32 24576, %s1148_s9  ;;  %p1227_p13 = pnand %p1014_p10, %p33_p5 }
  0x10   : > { %s1719_s17 = scalar_select %p1212_p11, 1, 0 }
  0x11   : > { %s1720_s18 = scalar_select %p1216_p12, 1, 0 }
  0x12   : > { %s998_s21 = smul.u32 1536, %s87_s19  ;;  %s1225_s24 = scalar_lea.hbm %s1715_s0, %s999_s20 }
  0x13   : > { %s1233_s28 = scalar_lea.sflag [#allocation3], %s87_s19  ;;  %s1052_s29 = scalar_lea.hbm %s1225_s24, 24576 }
  0x14   : > { %s91_s26 = scalar_lea.vmem [#allocation2], %s998_s21  ;;  %p1053_p0 = scmp.ne.s32.totalorder %s1225_s24, %s1052_s29 }
  0x15   : > { %s98_s27 = sshll.u32 %s91_s26, 4  ;;  %p1054_p1 = pneg %p1227_p13  ;;  %s1231_s27 = int_to_ptr.vmem [resolvable:$true] %s98_s27 }
  0x16   : > { %s1057_s3 = scalar_lea.hbm %s1715_s0, 49152  ;;  %p1058_p4 = scmp.lt.u32.totalorder %s1225_s24, %s1715_s0 }
  0x17   : > { %p1055_p2 = pnand %p1054_p1, %p1053_p0  ;;  %p1059_p5 = scmp.lt.u32.totalorder %s1057_s3, %s1052_s29 }
  0x18   : > { %p1061_p8 = scmp.lt.u32.totalorder %s1052_s29, %s1225_s24 }
  0x19   : > { %p1056_p3 = pneg %p1055_p2  ;;  %p1060_p7 = por %p1059_p5, %p1058_p4 }
  0x1b   : > { %p1062_p10 = por %p1061_p8, %p1060_p7 }
  0x1d   : > { %p1063_p9 = pnand %p1062_p10, %p1056_p3 }
  0x1f   : > { %1066 = shalt.err (!%p1063_p9)
}
  0x20   : > { %s1067_s11 = scalar_lea.vmem %s1231_s27, 24576  ;;  %s1150_s13 = smov [#allocation2]  }
  0x21   : > { %p1068_p0 = scmp.ne.s32.totalorder %s1231_s27, %s1067_s11  ;;  %s1072_s14 = sshll.u32 %s1150_s13, 4  ;;  %s1073_s14 = int_to_ptr.vmem [resolvable:$false] %s1072_s14 }
  0x22   : > { %s1074_s19 = scalar_lea.vmem %s1073_s14, 49152  ;;  %p1075_p11 = scmp.lt.s32.totalorder %s1231_s27, %s1073_s14 }
  0x23   : > { %p1070_p2 = pnand %p1068_p0, %p1054_p1  ;;  %p1076_p4 = scmp.lt.s32.totalorder %s1074_s19, %s1067_s11 }
  0x25   : > { %p1071_p12 = pneg %p1070_p2  ;;  %p1077_p5 = por %p1076_p4, %p1075_p11 }
  0x27   : > { %p1078_p7 = pnand %p1077_p5, %p1071_p12 }
  0x29   : > { %1081 = shalt.err (!%p1078_p7)
}
  0x2a   : > { %s1151_s20 = smov 768   ;;  %s1152_s21 = smov 48  }
  0x2b   : > { %1009 = dma.hbm_to_vmem [thread:$0]  (!%p1227_p13), %s1225_s24, 24576, %s1231_s27, %s1233_s28, %s1151_s20, %s1151_s20, %s1152_s21  }
  0x2c   : > { %p994_p9 = scmp.ge.s32.totalorder %s1148_s9, 1  ;;  %p106_p1 = scmp.lt.s32.totalorder %s1148_s9, 3 }
  0x2e   : > { %p107_p3 = pnand %p994_p9, %p106_p1 }
  0x2f   : > { %s1264_s22 = sand.u32 (!%p107_p3), 1, %s1140_s7  }
  0x30   : > { %110 = sbr.rel (%p107_p3) target bundleno = 581 (0x245), region = 24  ;;  %s113_s26 = scalar_lea.sflag (!%p107_p3), [#allocation3], %s1264_s22 }
  0x31   : > { %s1000_s23 = smul.u32 (!%p107_p3), 1536, %s1264_s22 }
  0x33   : > { %s1270_s29 = scalar_lea.vmem (!%p107_p3), [#allocation2], %s1000_s23 }
  0x37   : > { %1127 = dma.done.wait (%p1205_p6), %s113_s26, 24576  }
  0x38   : > { %1129 = vsyncadd (%p1205_p6), %s113_s26, 4294942720  ;;  %v136_v0 = vld [vmem:[%s1270_s29 + $0x8] sm:$0xff]  ;;  %v135_v1 = vld [vmem:[%s1270_s29] sm:$0xff]  ;;  %s1344_s16 = scalar_lea.vmem [#allocation5], %s1000_s23  ;;  %s1001_s24 = smul.u32 24576, %s1187_s10 }
  0x39   : > { %359 = vxpose.xlu1.b32.start [1/16] %v136_v0, 128  ;;  %327 = vxpose.xlu0.b32.start [1/16] %v135_v1, 128  ;;  %v142_v2 = vld [vmem:[%s1270_s29 + $0x38] sm:$0xff]  ;;  %v141_v3 = vld [vmem:[%s1270_s29 + $0x30] sm:$0xff]  ;;  %v148_v4 = vld [vmem:[%s1270_s29 + $0x68] sm:$0xff]  ;;  %s917_s25 = sshll.u32 %s1344_s16, 4  ;;  %s904_s10 = scalar_lea.sflag [#allocation4], %s1264_s22  ;;  %s1669_s25 = int_to_ptr.vmem [resolvable:$true] %s917_s25 }
  0x3a   : > { %v147_v5 = vld [vmem:[%s1270_s29 + $0x60] sm:$0xff]  ;;  %v154_v6 = vld [vmem:[%s1270_s29 + $0x98] sm:$0xff]  ;;  %v153_v7 = vld [vmem:[%s1270_s29 + $0x90] sm:$0xff]  ;;  %s1667_s30 = scalar_lea.hbm %s1716_s1, %s1001_s24  ;;  %s1082_s2 = scalar_lea.vmem %s1669_s25, 24576 }
  0x3b   : > { %v160_v8 = vld [vmem:[%s1270_s29 + $0xc8] sm:$0xff]  ;;  %v159_v9 = vld [vmem:[%s1270_s29 + $0xc0] sm:$0xff]  ;;  %v166_v10 = vld [vmem:[%s1270_s29 + $0xf8] sm:$0xff]  ;;  %p1083_p6 = scmp.ne.s32.totalorder %s1669_s25, %s1082_s2  ;;  %p1722_p11 = scmp.ne.s32.totalorder %s1719_s17, 0 }
  0x3c   : > { %v165_v11 = vld [vmem:[%s1270_s29 + $0xf0] sm:$0xff]  ;;  %v172_v12 = vld [vmem:[%s1270_s29 + $0x128] sm:$0xff]  ;;  %v171_v13 = vld [vmem:[%s1270_s29 + $0x120] sm:$0xff]  ;;  %s1153_s3 = smov [#allocation5]  }
  0x3d   : > { %360 = vxpose.xlu1.b32.cont [2/16] %v142_v2, 128  ;;  %328 = vxpose.xlu0.b32.cont [2/16] %v141_v3, 128  ;;  %v178_v14 = vld [vmem:[%s1270_s29 + $0x158] sm:$0xff]  ;;  %v177_v15 = vld [vmem:[%s1270_s29 + $0x150] sm:$0xff]  ;;  %v184_v16 = vld [vmem:[%s1270_s29 + $0x188] sm:$0xff]  ;;  %p1084_p12 = pnand %p1083_p6, %p1722_p11  ;;  %s1086_s4 = sshll.u32 %s1153_s3, 4  ;;  %s1087_s4 = int_to_ptr.vmem [resolvable:$false] %s1086_s4 }
  0x3e   : > { %v183_v17 = vld [vmem:[%s1270_s29 + $0x180] sm:$0xff]  ;;  %v190_v18 = vld [vmem:[%s1270_s29 + $0x1b8] sm:$0xff]  ;;  %v189_v19 = vld [vmem:[%s1270_s29 + $0x1b0] sm:$0xff]  ;;  %s1088_s5 = scalar_lea.vmem %s1087_s4, 49152  ;;  %p1089_p8 = scmp.lt.s32.totalorder %s1669_s25, %s1087_s4 }
  0x3f   : > { %v196_v20 = vld [vmem:[%s1270_s29 + $0x1e8] sm:$0xff]  ;;  %v195_v21 = vld [vmem:[%s1270_s29 + $0x1e0] sm:$0xff]  ;;  %v202_v22 = vld [vmem:[%s1270_s29 + $0x218] sm:$0xff]  ;;  %p1085_p13 = pneg %p1084_p12  ;;  %p1090_p10 = scmp.lt.s32.totalorder %s1088_s5, %s1082_s2 }
  0x40   : > { %v201_v23 = vld [vmem:[%s1270_s29 + $0x210] sm:$0xff]  ;;  %v208_v24 = vld [vmem:[%s1270_s29 + $0x248] sm:$0xff]  ;;  %v207_v25 = vld [vmem:[%s1270_s29 + $0x240] sm:$0xff] }
  0x41   : > { %361 = vxpose.xlu1.b32.cont [3/16] %v148_v4, 128  ;;  %329 = vxpose.xlu0.b32.cont [3/16] %v147_v5, 128  ;;  %v214_v26 = vld [vmem:[%s1270_s29 + $0x278] sm:$0xff]  ;;  %v213_v27 = vld [vmem:[%s1270_s29 + $0x270] sm:$0xff]  ;;  %v220_v28 = vld [vmem:[%s1270_s29 + $0x2a8] sm:$0xff]  ;;  %p1091_p0 = por %p1090_p10, %p1089_p8 }
  0x42   : > { %v219_v29 = vld [vmem:[%s1270_s29 + $0x2a0] sm:$0xff]  ;;  %v226_v30 = vld [vmem:[%s1270_s29 + $0x2d8] sm:$0xff]  ;;  %v225_v31 = vld [vmem:[%s1270_s29 + $0x2d0] sm:$0xff] }
  0x43   : > { %v138_v32 = vld [vmem:[%s1270_s29 + $0x18] sm:$0xff]  ;;  %v137_v33 = vld [vmem:[%s1270_s29 + $0x10] sm:$0xff]  ;;  %v144_v34 = vld [vmem:[%s1270_s29 + $0x48] sm:$0xff]  ;;  %p1092_p2 = pnand %p1091_p0, %p1085_p13 }
  0x44   : > { %v143_v35 = vld [vmem:[%s1270_s29 + $0x40] sm:$0xff]  ;;  %v150_v36 = vld [vmem:[%s1270_s29 + $0x78] sm:$0xff]  ;;  %v149_v37 = vld [vmem:[%s1270_s29 + $0x70] sm:$0xff] }
  0x45   : > { %362 = vxpose.xlu1.b32.cont [4/16] %v154_v6, 128  ;;  %330 = vxpose.xlu0.b32.cont [4/16] %v153_v7, 128  ;;  %v156_v38 = vld [vmem:[%s1270_s29 + $0xa8] sm:$0xff]  ;;  %v155_v39 = vld [vmem:[%s1270_s29 + $0xa0] sm:$0xff]  ;;  %v162_v40 = vld [vmem:[%s1270_s29 + $0xd8] sm:$0xff] }
  0x46   : > { %v161_v41 = vld [vmem:[%s1270_s29 + $0xd0] sm:$0xff]  ;;  %v168_v42 = vld [vmem:[%s1270_s29 + $0x108] sm:$0xff]  ;;  %v167_v43 = vld [vmem:[%s1270_s29 + $0x100] sm:$0xff] }
  0x47   : > { %v174_v44 = vld [vmem:[%s1270_s29 + $0x138] sm:$0xff]  ;;  %v173_v45 = vld [vmem:[%s1270_s29 + $0x130] sm:$0xff]  ;;  %v180_v46 = vld [vmem:[%s1270_s29 + $0x168] sm:$0xff] }
  0x48   : > { %v179_v47 = vld [vmem:[%s1270_s29 + $0x160] sm:$0xff]  ;;  %v186_v48 = vld [vmem:[%s1270_s29 + $0x198] sm:$0xff]  ;;  %v185_v49 = vld [vmem:[%s1270_s29 + $0x190] sm:$0xff] }
  0x49   : > { %363 = vxpose.xlu1.b32.cont [5/16] %v160_v8, 128  ;;  %331 = vxpose.xlu0.b32.cont [5/16] %v159_v9, 128  ;;  %v192_v50 = vld [vmem:[%s1270_s29 + $0x1c8] sm:$0xff]  ;;  %v191_v51 = vld [vmem:[%s1270_s29 + $0x1c0] sm:$0xff]  ;;  %v198_v52 = vld [vmem:[%s1270_s29 + $0x1f8] sm:$0xff] }
  0x4a   : > { %v197_v53 = vld [vmem:[%s1270_s29 + $0x1f0] sm:$0xff]  ;;  %v204_v54 = vld [vmem:[%s1270_s29 + $0x228] sm:$0xff]  ;;  %v203_v55 = vld [vmem:[%s1270_s29 + $0x220] sm:$0xff] }
  0x4b   : > { %v210_v56 = vld [vmem:[%s1270_s29 + $0x258] sm:$0xff]  ;;  %v209_v57 = vld [vmem:[%s1270_s29 + $0x250] sm:$0xff]  ;;  %v216_v58 = vld [vmem:[%s1270_s29 + $0x288] sm:$0xff] }
  0x4c   : > { %v215_v59 = vld [vmem:[%s1270_s29 + $0x280] sm:$0xff]  ;;  %v222_v60 = vld [vmem:[%s1270_s29 + $0x2b8] sm:$0xff]  ;;  %v221_v61 = vld [vmem:[%s1270_s29 + $0x2b0] sm:$0xff] }
  0x4d   : > { %364 = vxpose.xlu1.b32.cont [6/16] %v166_v10, 128  ;;  %332 = vxpose.xlu0.b32.cont [6/16] %v165_v11, 128  ;;  %v228_v62 = vld [vmem:[%s1270_s29 + $0x2e8] sm:$0xff]  ;;  %v227_v63 = vld [vmem:[%s1270_s29 + $0x2e0] sm:$0xff]  ;;  %v146_v4 = vld [vmem:[%s1270_s29 + $0x58] sm:$0xff] }
  0x4e   : > { %v140_v0 = vld [vmem:[%s1270_s29 + $0x28] sm:$0xff]  ;;  %v139_v1 = vld [vmem:[%s1270_s29 + $0x20] sm:$0xff]  ;;  %v145_v5 = vld [vmem:[%s1270_s29 + $0x50] sm:$0xff] }
  0x4f   : > { %v152_v8 = vld [vmem:[%s1270_s29 + $0x88] sm:$0xff]  ;;  %v151_v9 = vld [vmem:[%s1270_s29 + $0x80] sm:$0xff] }
  0x51   : > { %365 = vxpose.xlu1.b32.cont [7/16] %v172_v12, 128  ;;  %333 = vxpose.xlu0.b32.cont [7/16] %v171_v13, 128  ;;  %v158_v12 = vld [vmem:[%s1270_s29 + $0xb8] sm:$0xff]  ;;  %v157_v13 = vld [vmem:[%s1270_s29 + $0xb0] sm:$0xff] }
  0x55   : > { %366 = vxpose.xlu1.b32.cont [8/16] %v178_v14, 128  ;;  %334 = vxpose.xlu0.b32.cont [8/16] %v177_v15, 128 }
  0x59   : > { %367 = vxpose.xlu1.b32.cont [9/16] %v184_v16, 128  ;;  %335 = vxpose.xlu0.b32.cont [9/16] %v183_v17, 128  ;;  %v164_v16 = vld [vmem:[%s1270_s29 + $0xe8] sm:$0xff]  ;;  %v163_v17 = vld [vmem:[%s1270_s29 + $0xe0] sm:$0xff] }
  0x5d   : > { %368 = vxpose.xlu1.b32.cont [10/16] %v190_v18, 128  ;;  %336 = vxpose.xlu0.b32.cont [10/16] %v189_v19, 128 }
  0x61   : > { %369 = vxpose.xlu1.b32.cont [11/16] %v196_v20, 128  ;;  %337 = vxpose.xlu0.b32.cont [11/16] %v195_v21, 128  ;;  %v170_v20 = vld [vmem:[%s1270_s29 + $0x118] sm:$0xff]  ;;  %v169_v21 = vld [vmem:[%s1270_s29 + $0x110] sm:$0xff] }
  0x65   : > { %370 = vxpose.xlu1.b32.cont [12/16] %v202_v22, 128  ;;  %338 = vxpose.xlu0.b32.cont [12/16] %v201_v23, 128 }
  0x69   : > { %371 = vxpose.xlu1.b32.cont [13/16] %v208_v24, 128  ;;  %339 = vxpose.xlu0.b32.cont [13/16] %v207_v25, 128  ;;  %v176_v24 = vld [vmem:[%s1270_s29 + $0x148] sm:$0xff]  ;;  %v175_v25 = vld [vmem:[%s1270_s29 + $0x140] sm:$0xff] }
  0x6d   : > { %372 = vxpose.xlu1.b32.cont [14/16] %v214_v26, 128  ;;  %340 = vxpose.xlu0.b32.cont [14/16] %v213_v27, 128 }
  0x71   : > { %373 = vxpose.xlu1.b32.cont [15/16] %v220_v28, 128  ;;  %341 = vxpose.xlu0.b32.cont [15/16] %v219_v29, 128  ;;  %v182_v28 = vld [vmem:[%s1270_s29 + $0x178] sm:$0xff]  ;;  %v181_v29 = vld [vmem:[%s1270_s29 + $0x170] sm:$0xff] }
  0x75   : > { %374 = vxpose.xlu1.b32.end [16/16] %v226_v30, 128  ;;  %342 = vxpose.xlu0.b32.end [16/16] %v225_v31, 128 }
  0x79   : > { %423 = vxpose.xlu1.b32.start [1/16] %v138_v32, 128  ;;  %391 = vxpose.xlu0.b32.start [1/16] %v137_v33, 128  ;;  %v188_v32 = vld [vmem:[%s1270_s29 + $0x1a8] sm:$0xff]  ;;  %v187_v33 = vld [vmem:[%s1270_s29 + $0x1a0] sm:$0xff] }
  0x7d   : > { %424 = vxpose.xlu1.b32.cont [2/16] %v144_v34, 128  ;;  %392 = vxpose.xlu0.b32.cont [2/16] %v143_v35, 128 }
  0x81   : > { %425 = vxpose.xlu1.b32.cont [3/16] %v150_v36, 128  ;;  %393 = vxpose.xlu0.b32.cont [3/16] %v149_v37, 128  ;;  %v194_v36 = vld [vmem:[%s1270_s29 + $0x1d8] sm:$0xff]  ;;  %v193_v37 = vld [vmem:[%s1270_s29 + $0x1d0] sm:$0xff] }
  0x85   : > { %426 = vxpose.xlu1.b32.cont [4/16] %v156_v38, 128  ;;  %394 = vxpose.xlu0.b32.cont [4/16] %v155_v39, 128 }
  0x89   : > { %427 = vxpose.xlu1.b32.cont [5/16] %v162_v40, 128  ;;  %395 = vxpose.xlu0.b32.cont [5/16] %v161_v41, 128  ;;  %v200_v40 = vld [vmem:[%s1270_s29 + $0x208] sm:$0xff]  ;;  %v199_v41 = vld [vmem:[%s1270_s29 + $0x200] sm:$0xff] }
  0x8d   : > { %428 = vxpose.xlu1.b32.cont [6/16] %v168_v42, 128  ;;  %396 = vxpose.xlu0.b32.cont [6/16] %v167_v43, 128 }
  0x91   : > { %429 = vxpose.xlu1.b32.cont [7/16] %v174_v44, 128  ;;  %397 = vxpose.xlu0.b32.cont [7/16] %v173_v45, 128  ;;  %v206_v44 = vld [vmem:[%s1270_s29 + $0x238] sm:$0xff]  ;;  %v205_v45 = vld [vmem:[%s1270_s29 + $0x230] sm:$0xff] }
  0x95   : > { %430 = vxpose.xlu1.b32.cont [8/16] %v180_v46, 128  ;;  %398 = vxpose.xlu0.b32.cont [8/16] %v179_v47, 128 }
  0x99   : > { %431 = vxpose.xlu1.b32.cont [9/16] %v186_v48, 128  ;;  %399 = vxpose.xlu0.b32.cont [9/16] %v185_v49, 128  ;;  %v212_v48 = vld [vmem:[%s1270_s29 + $0x268] sm:$0xff]  ;;  %v211_v49 = vld [vmem:[%s1270_s29 + $0x260] sm:$0xff] }
  0x9d   : > { %432 = vxpose.xlu1.b32.cont [10/16] %v192_v50, 128  ;;  %400 = vxpose.xlu0.b32.cont [10/16] %v191_v51, 128 }
  0xa1   : > { %433 = vxpose.xlu1.b32.cont [11/16] %v198_v52, 128  ;;  %401 = vxpose.xlu0.b32.cont [11/16] %v197_v53, 128  ;;  %v218_v52 = vld [vmem:[%s1270_s29 + $0x298] sm:$0xff]  ;;  %v217_v53 = vld [vmem:[%s1270_s29 + $0x290] sm:$0xff] }
  0xa5   : > { %434 = vxpose.xlu1.b32.cont [12/16] %v204_v54, 128  ;;  %402 = vxpose.xlu0.b32.cont [12/16] %v203_v55, 128 }
  0xa9   : > { %435 = vxpose.xlu1.b32.cont [13/16] %v210_v56, 128  ;;  %403 = vxpose.xlu0.b32.cont [13/16] %v209_v57, 128  ;;  %v224_v56 = vld [vmem:[%s1270_s29 + $0x2c8] sm:$0xff]  ;;  %v223_v57 = vld [vmem:[%s1270_s29 + $0x2c0] sm:$0xff] }
  0xad   : > { %436 = vxpose.xlu1.b32.cont [14/16] %v216_v58, 128  ;;  %404 = vxpose.xlu0.b32.cont [14/16] %v215_v59, 128 }
  0xb1   : > { %437 = vxpose.xlu1.b32.cont [15/16] %v222_v60, 128  ;;  %405 = vxpose.xlu0.b32.cont [15/16] %v221_v61, 128  ;;  %v230_v60 = vld [vmem:[%s1270_s29 + $0x2f8] sm:$0xff]  ;;  %v229_v61 = vld [vmem:[%s1270_s29 + $0x2f0] sm:$0xff] }
  0xb5   : > { %438 = vxpose.xlu1.b32.end [16/16] %v228_v62, 128  ;;  %406 = vxpose.xlu0.b32.end [16/16] %v227_v63, 128 }
  0xb9   : > { %487 = vxpose.xlu1.b32.start [1/16] %v140_v0, 128  ;;  %v375_v2 = vpop.trf.xlu1  ;;  %455 = vxpose.xlu0.b32.start [1/16] %v139_v1, 128  ;;  %v343_v3 = vpop.trf.xlu0  ;;  %v232_v0 = vld [vmem:[%s1270_s29 + $0x308] sm:$0xff]  ;;  %v231_v1 = vld [vmem:[%s1270_s29 + $0x300] sm:$0xff] }
  0xba   : > { %743 = vst [vmem:[%s1344_s16 + $0x100] sm:$0xff] %v375_v2  ;;  %711 = vst [vmem:[%s1344_s16] sm:$0xff] %v343_v3 }
  0xbd   : > { %488 = vxpose.xlu1.b32.cont [2/16] %v146_v4, 128  ;;  %v376_v6 = vpop.trf.xlu1  ;;  %456 = vxpose.xlu0.b32.cont [2/16] %v145_v5, 128  ;;  %v344_v7 = vpop.trf.xlu0  ;;  %v238_v4 = vld [vmem:[%s1270_s29 + $0x338] sm:$0xff]  ;;  %v237_v5 = vld [vmem:[%s1270_s29 + $0x330] sm:$0xff] }
  0xbe   : > { %745 = vst [vmem:[%s1344_s16 + $0x110] sm:$0xff] %v376_v6  ;;  %713 = vst [vmem:[%s1344_s16 + $0x10] sm:$0xff] %v344_v7 }
  0xc1   : > { %489 = vxpose.xlu1.b32.cont [3/16] %v152_v8, 128  ;;  %v377_v10 = vpop.trf.xlu1  ;;  %457 = vxpose.xlu0.b32.cont [3/16] %v151_v9, 128  ;;  %v345_v11 = vpop.trf.xlu0  ;;  %v244_v8 = vld [vmem:[%s1270_s29 + $0x368] sm:$0xff]  ;;  %v243_v9 = vld [vmem:[%s1270_s29 + $0x360] sm:$0xff] }
  0xc2   : > { %747 = vst [vmem:[%s1344_s16 + $0x120] sm:$0xff] %v377_v10  ;;  %715 = vst [vmem:[%s1344_s16 + $0x20] sm:$0xff] %v345_v11 }
  0xc5   : > { %490 = vxpose.xlu1.b32.cont [4/16] %v158_v12, 128  ;;  %v378_v14 = vpop.trf.xlu1  ;;  %458 = vxpose.xlu0.b32.cont [4/16] %v157_v13, 128  ;;  %v346_v15 = vpop.trf.xlu0  ;;  %v250_v12 = vld [vmem:[%s1270_s29 + $0x398] sm:$0xff]  ;;  %v249_v13 = vld [vmem:[%s1270_s29 + $0x390] sm:$0xff] }
  0xc6   : > { %749 = vst [vmem:[%s1344_s16 + $0x130] sm:$0xff] %v378_v14  ;;  %717 = vst [vmem:[%s1344_s16 + $0x30] sm:$0xff] %v346_v15 }
  0xc9   : > { %491 = vxpose.xlu1.b32.cont [5/16] %v164_v16, 128  ;;  %v379_v18 = vpop.trf.xlu1  ;;  %459 = vxpose.xlu0.b32.cont [5/16] %v163_v17, 128  ;;  %v347_v19 = vpop.trf.xlu0  ;;  %v256_v16 = vld [vmem:[%s1270_s29 + $0x3c8] sm:$0xff]  ;;  %v255_v17 = vld [vmem:[%s1270_s29 + $0x3c0] sm:$0xff] }
  0xca   : > { %751 = vst [vmem:[%s1344_s16 + $0x140] sm:$0xff] %v379_v18  ;;  %719 = vst [vmem:[%s1344_s16 + $0x40] sm:$0xff] %v347_v19 }
  0xcd   : > { %492 = vxpose.xlu1.b32.cont [6/16] %v170_v20, 128  ;;  %v380_v22 = vpop.trf.xlu1  ;;  %460 = vxpose.xlu0.b32.cont [6/16] %v169_v21, 128  ;;  %v348_v23 = vpop.trf.xlu0  ;;  %v262_v20 = vld [vmem:[%s1270_s29 + $0x3f8] sm:$0xff]  ;;  %v261_v21 = vld [vmem:[%s1270_s29 + $0x3f0] sm:$0xff] }
  0xce   : > { %753 = vst [vmem:[%s1344_s16 + $0x150] sm:$0xff] %v380_v22  ;;  %721 = vst [vmem:[%s1344_s16 + $0x50] sm:$0xff] %v348_v23 }
  0xd1   : > { %493 = vxpose.xlu1.b32.cont [7/16] %v176_v24, 128  ;;  %v381_v26 = vpop.trf.xlu1  ;;  %461 = vxpose.xlu0.b32.cont [7/16] %v175_v25, 128  ;;  %v349_v27 = vpop.trf.xlu0  ;;  %v268_v24 = vld [vmem:[%s1270_s29 + $0x428] sm:$0xff]  ;;  %v267_v25 = vld [vmem:[%s1270_s29 + $0x420] sm:$0xff] }
  0xd2   : > { %755 = vst [vmem:[%s1344_s16 + $0x160] sm:$0xff] %v381_v26  ;;  %723 = vst [vmem:[%s1344_s16 + $0x60] sm:$0xff] %v349_v27 }
  0xd5   : > { %494 = vxpose.xlu1.b32.cont [8/16] %v182_v28, 128  ;;  %v382_v30 = vpop.trf.xlu1  ;;  %462 = vxpose.xlu0.b32.cont [8/16] %v181_v29, 128  ;;  %v350_v31 = vpop.trf.xlu0  ;;  %v274_v28 = vld [vmem:[%s1270_s29 + $0x458] sm:$0xff]  ;;  %v273_v29 = vld [vmem:[%s1270_s29 + $0x450] sm:$0xff] }
  0xd6   : > { %757 = vst [vmem:[%s1344_s16 + $0x170] sm:$0xff] %v382_v30  ;;  %725 = vst [vmem:[%s1344_s16 + $0x70] sm:$0xff] %v350_v31 }
  0xd9   : > { %495 = vxpose.xlu1.b32.cont [9/16] %v188_v32, 128  ;;  %v383_v34 = vpop.trf.xlu1  ;;  %463 = vxpose.xlu0.b32.cont [9/16] %v187_v33, 128  ;;  %v351_v35 = vpop.trf.xlu0  ;;  %v280_v32 = vld [vmem:[%s1270_s29 + $0x488] sm:$0xff]  ;;  %v279_v33 = vld [vmem:[%s1270_s29 + $0x480] sm:$0xff] }
  0xda   : > { %759 = vst [vmem:[%s1344_s16 + $0x180] sm:$0xff] %v383_v34  ;;  %727 = vst [vmem:[%s1344_s16 + $0x80] sm:$0xff] %v351_v35 }
  0xdd   : > { %496 = vxpose.xlu1.b32.cont [10/16] %v194_v36, 128  ;;  %v384_v38 = vpop.trf.xlu1  ;;  %464 = vxpose.xlu0.b32.cont [10/16] %v193_v37, 128  ;;  %v352_v39 = vpop.trf.xlu0  ;;  %v286_v36 = vld [vmem:[%s1270_s29 + $0x4b8] sm:$0xff]  ;;  %v285_v37 = vld [vmem:[%s1270_s29 + $0x4b0] sm:$0xff] }
  0xde   : > { %761 = vst [vmem:[%s1344_s16 + $0x190] sm:$0xff] %v384_v38  ;;  %729 = vst [vmem:[%s1344_s16 + $0x90] sm:$0xff] %v352_v39 }
  0xe1   : > { %497 = vxpose.xlu1.b32.cont [11/16] %v200_v40, 128  ;;  %v385_v42 = vpop.trf.xlu1  ;;  %465 = vxpose.xlu0.b32.cont [11/16] %v199_v41, 128  ;;  %v353_v43 = vpop.trf.xlu0  ;;  %v292_v40 = vld [vmem:[%s1270_s29 + $0x4e8] sm:$0xff]  ;;  %v291_v41 = vld [vmem:[%s1270_s29 + $0x4e0] sm:$0xff] }
  0xe2   : > { %763 = vst [vmem:[%s1344_s16 + $0x1a0] sm:$0xff] %v385_v42  ;;  %731 = vst [vmem:[%s1344_s16 + $0xa0] sm:$0xff] %v353_v43 }
  0xe5   : > { %498 = vxpose.xlu1.b32.cont [12/16] %v206_v44, 128  ;;  %v386_v46 = vpop.trf.xlu1  ;;  %466 = vxpose.xlu0.b32.cont [12/16] %v205_v45, 128  ;;  %v354_v47 = vpop.trf.xlu0  ;;  %v298_v44 = vld [vmem:[%s1270_s29 + $0x518] sm:$0xff]  ;;  %v297_v45 = vld [vmem:[%s1270_s29 + $0x510] sm:$0xff] }
  0xe6   : > { %765 = vst [vmem:[%s1344_s16 + $0x1b0] sm:$0xff] %v386_v46  ;;  %733 = vst [vmem:[%s1344_s16 + $0xb0] sm:$0xff] %v354_v47 }
  0xe9   : > { %499 = vxpose.xlu1.b32.cont [13/16] %v212_v48, 128  ;;  %v387_v50 = vpop.trf.xlu1  ;;  %467 = vxpose.xlu0.b32.cont [13/16] %v211_v49, 128  ;;  %v355_v51 = vpop.trf.xlu0  ;;  %v304_v48 = vld [vmem:[%s1270_s29 + $0x548] sm:$0xff]  ;;  %v303_v49 = vld [vmem:[%s1270_s29 + $0x540] sm:$0xff] }
  0xea   : > { %767 = vst [vmem:[%s1344_s16 + $0x1c0] sm:$0xff] %v387_v50  ;;  %735 = vst [vmem:[%s1344_s16 + $0xc0] sm:$0xff] %v355_v51 }
  0xed   : > { %500 = vxpose.xlu1.b32.cont [14/16] %v218_v52, 128  ;;  %v388_v54 = vpop.trf.xlu1  ;;  %468 = vxpose.xlu0.b32.cont [14/16] %v217_v53, 128  ;;  %v356_v55 = vpop.trf.xlu0  ;;  %v310_v52 = vld [vmem:[%s1270_s29 + $0x578] sm:$0xff]  ;;  %v309_v53 = vld [vmem:[%s1270_s29 + $0x570] sm:$0xff] }
  0xee   : > { %769 = vst [vmem:[%s1344_s16 + $0x1d0] sm:$0xff] %v388_v54  ;;  %737 = vst [vmem:[%s1344_s16 + $0xd0] sm:$0xff] %v356_v55 }
  0xf1   : > { %501 = vxpose.xlu1.b32.cont [15/16] %v224_v56, 128  ;;  %v389_v58 = vpop.trf.xlu1  ;;  %469 = vxpose.xlu0.b32.cont [15/16] %v223_v57, 128  ;;  %v357_v59 = vpop.trf.xlu0  ;;  %v316_v56 = vld [vmem:[%s1270_s29 + $0x5a8] sm:$0xff]  ;;  %v315_v57 = vld [vmem:[%s1270_s29 + $0x5a0] sm:$0xff] }
  0xf2   : > { %771 = vst [vmem:[%s1344_s16 + $0x1e0] sm:$0xff] %v389_v58  ;;  %739 = vst [vmem:[%s1344_s16 + $0xe0] sm:$0xff] %v357_v59 }
  0xf5   : > { %502 = vxpose.xlu1.b32.end [16/16] %v230_v60, 128  ;;  %v390_v62 = vpop.trf.xlu1  ;;  %470 = vxpose.xlu0.b32.end [16/16] %v229_v61, 128  ;;  %v358_v63 = vpop.trf.xlu0  ;;  %v322_v60 = vld [vmem:[%s1270_s29 + $0x5d8] sm:$0xff]  ;;  %v321_v61 = vld [vmem:[%s1270_s29 + $0x5d0] sm:$0xff] }
  0xf6   : > { %773 = vst [vmem:[%s1344_s16 + $0x1f0] sm:$0xff] %v390_v62  ;;  %741 = vst [vmem:[%s1344_s16 + $0xf0] sm:$0xff] %v358_v63 }
  0xf9   : > { %551 = vxpose.xlu1.b32.start [1/16] %v232_v0, 128  ;;  %v439_v2 = vpop.trf.xlu1  ;;  %519 = vxpose.xlu0.b32.start [1/16] %v231_v1, 128  ;;  %v407_v3 = vpop.trf.xlu0  ;;  %v234_v0 = vld [vmem:[%s1270_s29 + $0x318] sm:$0xff]  ;;  %v233_v1 = vld [vmem:[%s1270_s29 + $0x310] sm:$0xff] }
  0xfa   : > { %807 = vst [vmem:[%s1344_s16 + $0x300] sm:$0xff] %v439_v2  ;;  %775 = vst [vmem:[%s1344_s16 + $0x200] sm:$0xff] %v407_v3 }
  0xfd   : > { %552 = vxpose.xlu1.b32.cont [2/16] %v238_v4, 128  ;;  %v440_v6 = vpop.trf.xlu1  ;;  %520 = vxpose.xlu0.b32.cont [2/16] %v237_v5, 128  ;;  %v408_v7 = vpop.trf.xlu0  ;;  %v240_v4 = vld [vmem:[%s1270_s29 + $0x348] sm:$0xff]  ;;  %v239_v5 = vld [vmem:[%s1270_s29 + $0x340] sm:$0xff] }
  0xfe   : > { %809 = vst [vmem:[%s1344_s16 + $0x310] sm:$0xff] %v440_v6  ;;  %777 = vst [vmem:[%s1344_s16 + $0x210] sm:$0xff] %v408_v7 }
 0x101   : > { %553 = vxpose.xlu1.b32.cont [3/16] %v244_v8, 128  ;;  %v441_v10 = vpop.trf.xlu1  ;;  %521 = vxpose.xlu0.b32.cont [3/16] %v243_v9, 128  ;;  %v409_v11 = vpop.trf.xlu0  ;;  %v246_v8 = vld [vmem:[%s1270_s29 + $0x378] sm:$0xff]  ;;  %v245_v9 = vld [vmem:[%s1270_s29 + $0x370] sm:$0xff] }
 0x102   : > { %811 = vst [vmem:[%s1344_s16 + $0x320] sm:$0xff] %v441_v10  ;;  %779 = vst [vmem:[%s1344_s16 + $0x220] sm:$0xff] %v409_v11 }
 0x105   : > { %554 = vxpose.xlu1.b32.cont [4/16] %v250_v12, 128  ;;  %v442_v14 = vpop.trf.xlu1  ;;  %522 = vxpose.xlu0.b32.cont [4/16] %v249_v13, 128  ;;  %v410_v15 = vpop.trf.xlu0  ;;  %v252_v12 = vld [vmem:[%s1270_s29 + $0x3a8] sm:$0xff]  ;;  %v251_v13 = vld [vmem:[%s1270_s29 + $0x3a0] sm:$0xff] }
 0x106   : > { %813 = vst [vmem:[%s1344_s16 + $0x330] sm:$0xff] %v442_v14  ;;  %781 = vst [vmem:[%s1344_s16 + $0x230] sm:$0xff] %v410_v15 }
 0x109   : > { %555 = vxpose.xlu1.b32.cont [5/16] %v256_v16, 128  ;;  %v443_v18 = vpop.trf.xlu1  ;;  %523 = vxpose.xlu0.b32.cont [5/16] %v255_v17, 128  ;;  %v411_v19 = vpop.trf.xlu0  ;;  %v258_v16 = vld [vmem:[%s1270_s29 + $0x3d8] sm:$0xff]  ;;  %v257_v17 = vld [vmem:[%s1270_s29 + $0x3d0] sm:$0xff] }
 0x10a   : > { %815 = vst [vmem:[%s1344_s16 + $0x340] sm:$0xff] %v443_v18  ;;  %783 = vst [vmem:[%s1344_s16 + $0x240] sm:$0xff] %v411_v19 }
 0x10d   : > { %556 = vxpose.xlu1.b32.cont [6/16] %v262_v20, 128  ;;  %v444_v22 = vpop.trf.xlu1  ;;  %524 = vxpose.xlu0.b32.cont [6/16] %v261_v21, 128  ;;  %v412_v23 = vpop.trf.xlu0  ;;  %v264_v20 = vld [vmem:[%s1270_s29 + $0x408] sm:$0xff]  ;;  %v263_v21 = vld [vmem:[%s1270_s29 + $0x400] sm:$0xff] }
 0x10e   : > { %817 = vst [vmem:[%s1344_s16 + $0x350] sm:$0xff] %v444_v22  ;;  %785 = vst [vmem:[%s1344_s16 + $0x250] sm:$0xff] %v412_v23 }
 0x111   : > { %557 = vxpose.xlu1.b32.cont [7/16] %v268_v24, 128  ;;  %v445_v26 = vpop.trf.xlu1  ;;  %525 = vxpose.xlu0.b32.cont [7/16] %v267_v25, 128  ;;  %v413_v27 = vpop.trf.xlu0  ;;  %v270_v24 = vld [vmem:[%s1270_s29 + $0x438] sm:$0xff]  ;;  %v269_v25 = vld [vmem:[%s1270_s29 + $0x430] sm:$0xff] }
 0x112   : > { %819 = vst [vmem:[%s1344_s16 + $0x360] sm:$0xff] %v445_v26  ;;  %787 = vst [vmem:[%s1344_s16 + $0x260] sm:$0xff] %v413_v27 }
 0x115   : > { %558 = vxpose.xlu1.b32.cont [8/16] %v274_v28, 128  ;;  %v446_v30 = vpop.trf.xlu1  ;;  %526 = vxpose.xlu0.b32.cont [8/16] %v273_v29, 128  ;;  %v414_v31 = vpop.trf.xlu0  ;;  %v276_v28 = vld [vmem:[%s1270_s29 + $0x468] sm:$0xff]  ;;  %v275_v29 = vld [vmem:[%s1270_s29 + $0x460] sm:$0xff] }
 0x116   : > { %821 = vst [vmem:[%s1344_s16 + $0x370] sm:$0xff] %v446_v30  ;;  %789 = vst [vmem:[%s1344_s16 + $0x270] sm:$0xff] %v414_v31 }
 0x119   : > { %559 = vxpose.xlu1.b32.cont [9/16] %v280_v32, 128  ;;  %v447_v34 = vpop.trf.xlu1  ;;  %527 = vxpose.xlu0.b32.cont [9/16] %v279_v33, 128  ;;  %v415_v35 = vpop.trf.xlu0  ;;  %v282_v32 = vld [vmem:[%s1270_s29 + $0x498] sm:$0xff]  ;;  %v281_v33 = vld [vmem:[%s1270_s29 + $0x490] sm:$0xff] }
 0x11a   : > { %823 = vst [vmem:[%s1344_s16 + $0x380] sm:$0xff] %v447_v34  ;;  %791 = vst [vmem:[%s1344_s16 + $0x280] sm:$0xff] %v415_v35 }
 0x11d   : > { %560 = vxpose.xlu1.b32.cont [10/16] %v286_v36, 128  ;;  %v448_v38 = vpop.trf.xlu1  ;;  %528 = vxpose.xlu0.b32.cont [10/16] %v285_v37, 128  ;;  %v416_v39 = vpop.trf.xlu0  ;;  %v288_v36 = vld [vmem:[%s1270_s29 + $0x4c8] sm:$0xff]  ;;  %v287_v37 = vld [vmem:[%s1270_s29 + $0x4c0] sm:$0xff] }
 0x11e   : > { %825 = vst [vmem:[%s1344_s16 + $0x390] sm:$0xff] %v448_v38  ;;  %793 = vst [vmem:[%s1344_s16 + $0x290] sm:$0xff] %v416_v39 }
 0x121   : > { %561 = vxpose.xlu1.b32.cont [11/16] %v292_v40, 128  ;;  %v449_v42 = vpop.trf.xlu1  ;;  %529 = vxpose.xlu0.b32.cont [11/16] %v291_v41, 128  ;;  %v417_v43 = vpop.trf.xlu0  ;;  %v294_v40 = vld [vmem:[%s1270_s29 + $0x4f8] sm:$0xff]  ;;  %v293_v41 = vld [vmem:[%s1270_s29 + $0x4f0] sm:$0xff] }
 0x122   : > { %827 = vst [vmem:[%s1344_s16 + $0x3a0] sm:$0xff] %v449_v42  ;;  %795 = vst [vmem:[%s1344_s16 + $0x2a0] sm:$0xff] %v417_v43 }
 0x125   : > { %562 = vxpose.xlu1.b32.cont [12/16] %v298_v44, 128  ;;  %v450_v46 = vpop.trf.xlu1  ;;  %530 = vxpose.xlu0.b32.cont [12/16] %v297_v45, 128  ;;  %v418_v47 = vpop.trf.xlu0  ;;  %v300_v44 = vld [vmem:[%s1270_s29 + $0x528] sm:$0xff]  ;;  %v299_v45 = vld [vmem:[%s1270_s29 + $0x520] sm:$0xff] }
 0x126   : > { %829 = vst [vmem:[%s1344_s16 + $0x3b0] sm:$0xff] %v450_v46  ;;  %797 = vst [vmem:[%s1344_s16 + $0x2b0] sm:$0xff] %v418_v47 }
 0x129   : > { %563 = vxpose.xlu1.b32.cont [13/16] %v304_v48, 128  ;;  %v451_v50 = vpop.trf.xlu1  ;;  %531 = vxpose.xlu0.b32.cont [13/16] %v303_v49, 128  ;;  %v419_v51 = vpop.trf.xlu0  ;;  %v306_v48 = vld [vmem:[%s1270_s29 + $0x558] sm:$0xff]  ;;  %v305_v49 = vld [vmem:[%s1270_s29 + $0x550] sm:$0xff] }
 0x12a   : > { %831 = vst [vmem:[%s1344_s16 + $0x3c0] sm:$0xff] %v451_v50  ;;  %799 = vst [vmem:[%s1344_s16 + $0x2c0] sm:$0xff] %v419_v51 }
 0x12d   : > { %564 = vxpose.xlu1.b32.cont [14/16] %v310_v52, 128  ;;  %v452_v54 = vpop.trf.xlu1  ;;  %532 = vxpose.xlu0.b32.cont [14/16] %v309_v53, 128  ;;  %v420_v55 = vpop.trf.xlu0  ;;  %v312_v52 = vld [vmem:[%s1270_s29 + $0x588] sm:$0xff]  ;;  %v311_v53 = vld [vmem:[%s1270_s29 + $0x580] sm:$0xff] }
 0x12e   : > { %833 = vst [vmem:[%s1344_s16 + $0x3d0] sm:$0xff] %v452_v54  ;;  %801 = vst [vmem:[%s1344_s16 + $0x2d0] sm:$0xff] %v420_v55 }
 0x131   : > { %565 = vxpose.xlu1.b32.cont [15/16] %v316_v56, 128  ;;  %v453_v58 = vpop.trf.xlu1  ;;  %533 = vxpose.xlu0.b32.cont [15/16] %v315_v57, 128  ;;  %v421_v59 = vpop.trf.xlu0  ;;  %v318_v56 = vld [vmem:[%s1270_s29 + $0x5b8] sm:$0xff]  ;;  %v317_v57 = vld [vmem:[%s1270_s29 + $0x5b0] sm:$0xff] }
 0x132   : > { %835 = vst [vmem:[%s1344_s16 + $0x3e0] sm:$0xff] %v453_v58  ;;  %803 = vst [vmem:[%s1344_s16 + $0x2e0] sm:$0xff] %v421_v59 }
 0x135   : > { %566 = vxpose.xlu1.b32.end [16/16] %v322_v60, 128  ;;  %v454_v62 = vpop.trf.xlu1  ;;  %534 = vxpose.xlu0.b32.end [16/16] %v321_v61, 128  ;;  %v422_v63 = vpop.trf.xlu0  ;;  %v324_v60 = vld [vmem:[%s1270_s29 + $0x5e8] sm:$0xff]  ;;  %v323_v61 = vld [vmem:[%s1270_s29 + $0x5e0] sm:$0xff] }
 0x136   : > { %837 = vst [vmem:[%s1344_s16 + $0x3f0] sm:$0xff] %v454_v62  ;;  %805 = vst [vmem:[%s1344_s16 + $0x2f0] sm:$0xff] %v422_v63 }
 0x139   : > { %615 = vxpose.xlu1.b32.start [1/16] %v234_v0, 128  ;;  %v503_v2 = vpop.trf.xlu1  ;;  %583 = vxpose.xlu0.b32.start [1/16] %v233_v1, 128  ;;  %v471_v3 = vpop.trf.xlu0  ;;  %v236_v0 = vld [vmem:[%s1270_s29 + $0x328] sm:$0xff]  ;;  %v235_v1 = vld [vmem:[%s1270_s29 + $0x320] sm:$0xff] }
 0x13a   : > { %871 = vst [vmem:[%s1344_s16 + $0x500] sm:$0xff] %v503_v2  ;;  %839 = vst [vmem:[%s1344_s16 + $0x400] sm:$0xff] %v471_v3 }
 0x13d   : > { %616 = vxpose.xlu1.b32.cont [2/16] %v240_v4, 128  ;;  %v504_v6 = vpop.trf.xlu1  ;;  %584 = vxpose.xlu0.b32.cont [2/16] %v239_v5, 128  ;;  %v472_v7 = vpop.trf.xlu0  ;;  %v242_v4 = vld [vmem:[%s1270_s29 + $0x358] sm:$0xff]  ;;  %v241_v5 = vld [vmem:[%s1270_s29 + $0x350] sm:$0xff] }
 0x13e   : > { %873 = vst [vmem:[%s1344_s16 + $0x510] sm:$0xff] %v504_v6  ;;  %841 = vst [vmem:[%s1344_s16 + $0x410] sm:$0xff] %v472_v7 }
 0x141   : > { %617 = vxpose.xlu1.b32.cont [3/16] %v246_v8, 128  ;;  %v505_v10 = vpop.trf.xlu1  ;;  %585 = vxpose.xlu0.b32.cont [3/16] %v245_v9, 128  ;;  %v473_v11 = vpop.trf.xlu0  ;;  %v248_v8 = vld [vmem:[%s1270_s29 + $0x388] sm:$0xff]  ;;  %v247_v9 = vld [vmem:[%s1270_s29 + $0x380] sm:$0xff] }
 0x142   : > { %875 = vst [vmem:[%s1344_s16 + $0x520] sm:$0xff] %v505_v10  ;;  %843 = vst [vmem:[%s1344_s16 + $0x420] sm:$0xff] %v473_v11 }
 0x145   : > { %618 = vxpose.xlu1.b32.cont [4/16] %v252_v12, 128  ;;  %v506_v14 = vpop.trf.xlu1  ;;  %586 = vxpose.xlu0.b32.cont [4/16] %v251_v13, 128  ;;  %v474_v15 = vpop.trf.xlu0  ;;  %v254_v12 = vld [vmem:[%s1270_s29 + $0x3b8] sm:$0xff]  ;;  %v253_v13 = vld [vmem:[%s1270_s29 + $0x3b0] sm:$0xff] }
 0x146   : > { %877 = vst [vmem:[%s1344_s16 + $0x530] sm:$0xff] %v506_v14  ;;  %845 = vst [vmem:[%s1344_s16 + $0x430] sm:$0xff] %v474_v15 }
 0x149   : > { %619 = vxpose.xlu1.b32.cont [5/16] %v258_v16, 128  ;;  %v507_v18 = vpop.trf.xlu1  ;;  %587 = vxpose.xlu0.b32.cont [5/16] %v257_v17, 128  ;;  %v475_v19 = vpop.trf.xlu0  ;;  %v260_v16 = vld [vmem:[%s1270_s29 + $0x3e8] sm:$0xff]  ;;  %v259_v17 = vld [vmem:[%s1270_s29 + $0x3e0] sm:$0xff] }
 0x14a   : > { %879 = vst [vmem:[%s1344_s16 + $0x540] sm:$0xff] %v507_v18  ;;  %847 = vst [vmem:[%s1344_s16 + $0x440] sm:$0xff] %v475_v19 }
 0x14d   : > { %620 = vxpose.xlu1.b32.cont [6/16] %v264_v20, 128  ;;  %v508_v22 = vpop.trf.xlu1  ;;  %588 = vxpose.xlu0.b32.cont [6/16] %v263_v21, 128  ;;  %v476_v23 = vpop.trf.xlu0  ;;  %v266_v20 = vld [vmem:[%s1270_s29 + $0x418] sm:$0xff]  ;;  %v265_v21 = vld [vmem:[%s1270_s29 + $0x410] sm:$0xff] }
 0x14e   : > { %881 = vst [vmem:[%s1344_s16 + $0x550] sm:$0xff] %v508_v22  ;;  %849 = vst [vmem:[%s1344_s16 + $0x450] sm:$0xff] %v476_v23 }
 0x151   : > { %621 = vxpose.xlu1.b32.cont [7/16] %v270_v24, 128  ;;  %v509_v26 = vpop.trf.xlu1  ;;  %589 = vxpose.xlu0.b32.cont [7/16] %v269_v25, 128  ;;  %v477_v27 = vpop.trf.xlu0  ;;  %v272_v24 = vld [vmem:[%s1270_s29 + $0x448] sm:$0xff]  ;;  %v271_v25 = vld [vmem:[%s1270_s29 + $0x440] sm:$0xff] }
 0x152   : > { %883 = vst [vmem:[%s1344_s16 + $0x560] sm:$0xff] %v509_v26  ;;  %851 = vst [vmem:[%s1344_s16 + $0x460] sm:$0xff] %v477_v27 }
 0x155   : > { %622 = vxpose.xlu1.b32.cont [8/16] %v276_v28, 128  ;;  %v510_v30 = vpop.trf.xlu1  ;;  %590 = vxpose.xlu0.b32.cont [8/16] %v275_v29, 128  ;;  %v478_v31 = vpop.trf.xlu0  ;;  %v278_v28 = vld [vmem:[%s1270_s29 + $0x478] sm:$0xff]  ;;  %v277_v29 = vld [vmem:[%s1270_s29 + $0x470] sm:$0xff] }
 0x156   : > { %885 = vst [vmem:[%s1344_s16 + $0x570] sm:$0xff] %v510_v30  ;;  %853 = vst [vmem:[%s1344_s16 + $0x470] sm:$0xff] %v478_v31 }
 0x159   : > { %623 = vxpose.xlu1.b32.cont [9/16] %v282_v32, 128  ;;  %v511_v34 = vpop.trf.xlu1  ;;  %591 = vxpose.xlu0.b32.cont [9/16] %v281_v33, 128  ;;  %v479_v35 = vpop.trf.xlu0  ;;  %v284_v32 = vld [vmem:[%s1270_s29 + $0x4a8] sm:$0xff]  ;;  %v283_v33 = vld [vmem:[%s1270_s29 + $0x4a0] sm:$0xff] }
 0x15a   : > { %887 = vst [vmem:[%s1344_s16 + $0x580] sm:$0xff] %v511_v34  ;;  %855 = vst [vmem:[%s1344_s16 + $0x480] sm:$0xff] %v479_v35 }
 0x15d   : > { %624 = vxpose.xlu1.b32.cont [10/16] %v288_v36, 128  ;;  %v512_v38 = vpop.trf.xlu1  ;;  %592 = vxpose.xlu0.b32.cont [10/16] %v287_v37, 128  ;;  %v480_v39 = vpop.trf.xlu0  ;;  %v290_v36 = vld [vmem:[%s1270_s29 + $0x4d8] sm:$0xff]  ;;  %v289_v37 = vld [vmem:[%s1270_s29 + $0x4d0] sm:$0xff] }
 0x15e   : > { %889 = vst [vmem:[%s1344_s16 + $0x590] sm:$0xff] %v512_v38  ;;  %857 = vst [vmem:[%s1344_s16 + $0x490] sm:$0xff] %v480_v39 }
 0x161   : > { %625 = vxpose.xlu1.b32.cont [11/16] %v294_v40, 128  ;;  %v513_v42 = vpop.trf.xlu1  ;;  %593 = vxpose.xlu0.b32.cont [11/16] %v293_v41, 128  ;;  %v481_v43 = vpop.trf.xlu0  ;;  %v296_v40 = vld [vmem:[%s1270_s29 + $0x508] sm:$0xff]  ;;  %v295_v41 = vld [vmem:[%s1270_s29 + $0x500] sm:$0xff] }
 0x162   : > { %891 = vst [vmem:[%s1344_s16 + $0x5a0] sm:$0xff] %v513_v42  ;;  %859 = vst [vmem:[%s1344_s16 + $0x4a0] sm:$0xff] %v481_v43 }
 0x165   : > { %626 = vxpose.xlu1.b32.cont [12/16] %v300_v44, 128  ;;  %v514_v46 = vpop.trf.xlu1  ;;  %594 = vxpose.xlu0.b32.cont [12/16] %v299_v45, 128  ;;  %v482_v47 = vpop.trf.xlu0  ;;  %v302_v44 = vld [vmem:[%s1270_s29 + $0x538] sm:$0xff]  ;;  %v301_v45 = vld [vmem:[%s1270_s29 + $0x530] sm:$0xff] }
 0x166   : > { %893 = vst [vmem:[%s1344_s16 + $0x5b0] sm:$0xff] %v514_v46  ;;  %861 = vst [vmem:[%s1344_s16 + $0x4b0] sm:$0xff] %v482_v47 }
 0x169   : > { %627 = vxpose.xlu1.b32.cont [13/16] %v306_v48, 128  ;;  %v515_v50 = vpop.trf.xlu1  ;;  %595 = vxpose.xlu0.b32.cont [13/16] %v305_v49, 128  ;;  %v483_v51 = vpop.trf.xlu0  ;;  %v308_v48 = vld [vmem:[%s1270_s29 + $0x568] sm:$0xff]  ;;  %v307_v49 = vld [vmem:[%s1270_s29 + $0x560] sm:$0xff] }
 0x16a   : > { %895 = vst [vmem:[%s1344_s16 + $0x5c0] sm:$0xff] %v515_v50  ;;  %863 = vst [vmem:[%s1344_s16 + $0x4c0] sm:$0xff] %v483_v51 }
 0x16d   : > { %628 = vxpose.xlu1.b32.cont [14/16] %v312_v52, 128  ;;  %v516_v54 = vpop.trf.xlu1  ;;  %596 = vxpose.xlu0.b32.cont [14/16] %v311_v53, 128  ;;  %v484_v55 = vpop.trf.xlu0  ;;  %v314_v52 = vld [vmem:[%s1270_s29 + $0x598] sm:$0xff]  ;;  %v313_v53 = vld [vmem:[%s1270_s29 + $0x590] sm:$0xff] }
 0x16e   : > { %897 = vst [vmem:[%s1344_s16 + $0x5d0] sm:$0xff] %v516_v54  ;;  %865 = vst [vmem:[%s1344_s16 + $0x4d0] sm:$0xff] %v484_v55 }
 0x171   : > { %629 = vxpose.xlu1.b32.cont [15/16] %v318_v56, 128  ;;  %v517_v58 = vpop.trf.xlu1  ;;  %597 = vxpose.xlu0.b32.cont [15/16] %v317_v57, 128  ;;  %v485_v59 = vpop.trf.xlu0  ;;  %v320_v56 = vld [vmem:[%s1270_s29 + $0x5c8] sm:$0xff]  ;;  %v319_v57 = vld [vmem:[%s1270_s29 + $0x5c0] sm:$0xff] }
 0x172   : > { %899 = vst [vmem:[%s1344_s16 + $0x5e0] sm:$0xff] %v517_v58  ;;  %867 = vst [vmem:[%s1344_s16 + $0x4e0] sm:$0xff] %v485_v59 }
 0x175   : > { %630 = vxpose.xlu1.b32.end [16/16] %v324_v60, 128  ;;  %v518_v62 = vpop.trf.xlu1  ;;  %598 = vxpose.xlu0.b32.end [16/16] %v323_v61, 128  ;;  %v486_v63 = vpop.trf.xlu0  ;;  %v326_v60 = vld [vmem:[%s1270_s29 + $0x5f8] sm:$0xff]  ;;  %v325_v61 = vld [vmem:[%s1270_s29 + $0x5f0] sm:$0xff] }
 0x176   : > { %901 = vst [vmem:[%s1344_s16 + $0x5f0] sm:$0xff] %v518_v62  ;;  %869 = vst [vmem:[%s1344_s16 + $0x4f0] sm:$0xff] %v486_v63 }
 0x179   : > { %679 = vxpose.xlu1.b32.start [1/16] %v236_v0, 128  ;;  %v567_v2 = vpop.trf.xlu1  ;;  %647 = vxpose.xlu0.b32.start [1/16] %v235_v1, 128  ;;  %v535_v3 = vpop.trf.xlu0 }
 0x17a   : > { %744 = vst [vmem:[%s1344_s16 + $0x108] sm:$0xff] %v567_v2  ;;  %712 = vst [vmem:[%s1344_s16 + $0x8] sm:$0xff] %v535_v3 }
 0x17d   : > { %680 = vxpose.xlu1.b32.cont [2/16] %v242_v4, 128  ;;  %v568_v6 = vpop.trf.xlu1  ;;  %648 = vxpose.xlu0.b32.cont [2/16] %v241_v5, 128  ;;  %v536_v7 = vpop.trf.xlu0 }
 0x17e   : > { %746 = vst [vmem:[%s1344_s16 + $0x118] sm:$0xff] %v568_v6  ;;  %714 = vst [vmem:[%s1344_s16 + $0x18] sm:$0xff] %v536_v7 }
 0x181   : > { %681 = vxpose.xlu1.b32.cont [3/16] %v248_v8, 128  ;;  %v569_v10 = vpop.trf.xlu1  ;;  %649 = vxpose.xlu0.b32.cont [3/16] %v247_v9, 128  ;;  %v537_v11 = vpop.trf.xlu0 }
 0x182   : > { %748 = vst [vmem:[%s1344_s16 + $0x128] sm:$0xff] %v569_v10  ;;  %716 = vst [vmem:[%s1344_s16 + $0x28] sm:$0xff] %v537_v11 }
 0x185   : > { %682 = vxpose.xlu1.b32.cont [4/16] %v254_v12, 128  ;;  %v570_v14 = vpop.trf.xlu1  ;;  %650 = vxpose.xlu0.b32.cont [4/16] %v253_v13, 128  ;;  %v538_v15 = vpop.trf.xlu0 }
 0x186   : > { %750 = vst [vmem:[%s1344_s16 + $0x138] sm:$0xff] %v570_v14  ;;  %718 = vst [vmem:[%s1344_s16 + $0x38] sm:$0xff] %v538_v15 }
 0x189   : > { %683 = vxpose.xlu1.b32.cont [5/16] %v260_v16, 128  ;;  %v571_v18 = vpop.trf.xlu1  ;;  %651 = vxpose.xlu0.b32.cont [5/16] %v259_v17, 128  ;;  %v539_v19 = vpop.trf.xlu0 }
 0x18a   : > { %752 = vst [vmem:[%s1344_s16 + $0x148] sm:$0xff] %v571_v18  ;;  %720 = vst [vmem:[%s1344_s16 + $0x48] sm:$0xff] %v539_v19 }
 0x18d   : > { %684 = vxpose.xlu1.b32.cont [6/16] %v266_v20, 128  ;;  %v572_v22 = vpop.trf.xlu1  ;;  %652 = vxpose.xlu0.b32.cont [6/16] %v265_v21, 128  ;;  %v540_v23 = vpop.trf.xlu0 }
 0x18e   : > { %754 = vst [vmem:[%s1344_s16 + $0x158] sm:$0xff] %v572_v22  ;;  %722 = vst [vmem:[%s1344_s16 + $0x58] sm:$0xff] %v540_v23 }
 0x191   : > { %685 = vxpose.xlu1.b32.cont [7/16] %v272_v24, 128  ;;  %v573_v26 = vpop.trf.xlu1  ;;  %653 = vxpose.xlu0.b32.cont [7/16] %v271_v25, 128  ;;  %v541_v27 = vpop.trf.xlu0 }
 0x192   : > { %756 = vst [vmem:[%s1344_s16 + $0x168] sm:$0xff] %v573_v26  ;;  %724 = vst [vmem:[%s1344_s16 + $0x68] sm:$0xff] %v541_v27 }
 0x195   : > { %686 = vxpose.xlu1.b32.cont [8/16] %v278_v28, 128  ;;  %v574_v30 = vpop.trf.xlu1  ;;  %654 = vxpose.xlu0.b32.cont [8/16] %v277_v29, 128  ;;  %v542_v31 = vpop.trf.xlu0 }
 0x196   : > { %758 = vst [vmem:[%s1344_s16 + $0x178] sm:$0xff] %v574_v30  ;;  %726 = vst [vmem:[%s1344_s16 + $0x78] sm:$0xff] %v542_v31 }
 0x199   : > { %687 = vxpose.xlu1.b32.cont [9/16] %v284_v32, 128  ;;  %v575_v34 = vpop.trf.xlu1  ;;  %655 = vxpose.xlu0.b32.cont [9/16] %v283_v33, 128  ;;  %v543_v35 = vpop.trf.xlu0 }
 0x19a   : > { %760 = vst [vmem:[%s1344_s16 + $0x188] sm:$0xff] %v575_v34  ;;  %728 = vst [vmem:[%s1344_s16 + $0x88] sm:$0xff] %v543_v35 }
 0x19d   : > { %688 = vxpose.xlu1.b32.cont [10/16] %v290_v36, 128  ;;  %v576_v38 = vpop.trf.xlu1  ;;  %656 = vxpose.xlu0.b32.cont [10/16] %v289_v37, 128  ;;  %v544_v39 = vpop.trf.xlu0 }
 0x19e   : > { %762 = vst [vmem:[%s1344_s16 + $0x198] sm:$0xff] %v576_v38  ;;  %730 = vst [vmem:[%s1344_s16 + $0x98] sm:$0xff] %v544_v39 }
 0x1a1   : > { %689 = vxpose.xlu1.b32.cont [11/16] %v296_v40, 128  ;;  %v577_v42 = vpop.trf.xlu1  ;;  %657 = vxpose.xlu0.b32.cont [11/16] %v295_v41, 128  ;;  %v545_v43 = vpop.trf.xlu0 }
 0x1a2   : > { %764 = vst [vmem:[%s1344_s16 + $0x1a8] sm:$0xff] %v577_v42  ;;  %732 = vst [vmem:[%s1344_s16 + $0xa8] sm:$0xff] %v545_v43 }
 0x1a5   : > { %690 = vxpose.xlu1.b32.cont [12/16] %v302_v44, 128  ;;  %v578_v46 = vpop.trf.xlu1  ;;  %658 = vxpose.xlu0.b32.cont [12/16] %v301_v45, 128  ;;  %v546_v47 = vpop.trf.xlu0 }
 0x1a6   : > { %766 = vst [vmem:[%s1344_s16 + $0x1b8] sm:$0xff] %v578_v46  ;;  %734 = vst [vmem:[%s1344_s16 + $0xb8] sm:$0xff] %v546_v47 }
 0x1a9   : > { %691 = vxpose.xlu1.b32.cont [13/16] %v308_v48, 128  ;;  %v579_v50 = vpop.trf.xlu1  ;;  %659 = vxpose.xlu0.b32.cont [13/16] %v307_v49, 128  ;;  %v547_v51 = vpop.trf.xlu0 }
 0x1aa   : > { %768 = vst [vmem:[%s1344_s16 + $0x1c8] sm:$0xff] %v579_v50  ;;  %736 = vst [vmem:[%s1344_s16 + $0xc8] sm:$0xff] %v547_v51 }
 0x1ad   : > { %692 = vxpose.xlu1.b32.cont [14/16] %v314_v52, 128  ;;  %v580_v54 = vpop.trf.xlu1  ;;  %660 = vxpose.xlu0.b32.cont [14/16] %v313_v53, 128  ;;  %v548_v55 = vpop.trf.xlu0 }
 0x1ae   : > { %770 = vst [vmem:[%s1344_s16 + $0x1d8] sm:$0xff] %v580_v54  ;;  %738 = vst [vmem:[%s1344_s16 + $0xd8] sm:$0xff] %v548_v55 }
 0x1b1   : > { %693 = vxpose.xlu1.b32.cont [15/16] %v320_v56, 128  ;;  %v581_v58 = vpop.trf.xlu1  ;;  %661 = vxpose.xlu0.b32.cont [15/16] %v319_v57, 128  ;;  %v549_v59 = vpop.trf.xlu0 }
 0x1b2   : > { %772 = vst [vmem:[%s1344_s16 + $0x1e8] sm:$0xff] %v581_v58  ;;  %740 = vst [vmem:[%s1344_s16 + $0xe8] sm:$0xff] %v549_v59 }
 0x1b5   : > { %694 = vxpose.xlu1.b32.end [16/16] %v326_v60, 128  ;;  %v582_v62 = vpop.trf.xlu1  ;;  %662 = vxpose.xlu0.b32.end [16/16] %v325_v61, 128  ;;  %v550_v63 = vpop.trf.xlu0 }
 0x1b6   : > { %774 = vst [vmem:[%s1344_s16 + $0x1f8] sm:$0xff] %v582_v62  ;;  %742 = vst [vmem:[%s1344_s16 + $0xf8] sm:$0xff] %v550_v63 }
 0x1b9   : > { %v631_v0 = vpop.trf.xlu1  ;;  %v599_v1 = vpop.trf.xlu0 }
 0x1ba   : > { %808 = vst [vmem:[%s1344_s16 + $0x308] sm:$0xff] %v631_v0  ;;  %776 = vst [vmem:[%s1344_s16 + $0x208] sm:$0xff] %v599_v1 }
 0x1bd   : > { %v632_v2 = vpop.trf.xlu1  ;;  %v600_v3 = vpop.trf.xlu0 }
 0x1be   : > { %810 = vst [vmem:[%s1344_s16 + $0x318] sm:$0xff] %v632_v2  ;;  %778 = vst [vmem:[%s1344_s16 + $0x218] sm:$0xff] %v600_v3 }
 0x1c1   : > { %v633_v4 = vpop.trf.xlu1  ;;  %v601_v5 = vpop.trf.xlu0 }
 0x1c2   : > { %812 = vst [vmem:[%s1344_s16 + $0x328] sm:$0xff] %v633_v4  ;;  %780 = vst [vmem:[%s1344_s16 + $0x228] sm:$0xff] %v601_v5 }
 0x1c5   : > { %v634_v6 = vpop.trf.xlu1  ;;  %v602_v7 = vpop.trf.xlu0 }
 0x1c6   : > { %814 = vst [vmem:[%s1344_s16 + $0x338] sm:$0xff] %v634_v6  ;;  %782 = vst [vmem:[%s1344_s16 + $0x238] sm:$0xff] %v602_v7 }
 0x1c9   : > { %v635_v8 = vpop.trf.xlu1  ;;  %v603_v9 = vpop.trf.xlu0 }
 0x1ca   : > { %816 = vst [vmem:[%s1344_s16 + $0x348] sm:$0xff] %v635_v8  ;;  %784 = vst [vmem:[%s1344_s16 + $0x248] sm:$0xff] %v603_v9 }
 0x1cd   : > { %v636_v10 = vpop.trf.xlu1  ;;  %v604_v11 = vpop.trf.xlu0 }
 0x1ce   : > { %818 = vst [vmem:[%s1344_s16 + $0x358] sm:$0xff] %v636_v10  ;;  %786 = vst [vmem:[%s1344_s16 + $0x258] sm:$0xff] %v604_v11 }
 0x1d1   : > { %v637_v12 = vpop.trf.xlu1  ;;  %v605_v13 = vpop.trf.xlu0 }
 0x1d2   : > { %820 = vst [vmem:[%s1344_s16 + $0x368] sm:$0xff] %v637_v12  ;;  %788 = vst [vmem:[%s1344_s16 + $0x268] sm:$0xff] %v605_v13 }
 0x1d5   : > { %v638_v14 = vpop.trf.xlu1  ;;  %v606_v15 = vpop.trf.xlu0 }
 0x1d6   : > { %822 = vst [vmem:[%s1344_s16 + $0x378] sm:$0xff] %v638_v14  ;;  %790 = vst [vmem:[%s1344_s16 + $0x278] sm:$0xff] %v606_v15 }
 0x1d9   : > { %v639_v16 = vpop.trf.xlu1  ;;  %v607_v17 = vpop.trf.xlu0 }
 0x1da   : > { %824 = vst [vmem:[%s1344_s16 + $0x388] sm:$0xff] %v639_v16  ;;  %792 = vst [vmem:[%s1344_s16 + $0x288] sm:$0xff] %v607_v17 }
 0x1dd   : > { %v640_v18 = vpop.trf.xlu1  ;;  %v608_v19 = vpop.trf.xlu0 }
 0x1de   : > { %826 = vst [vmem:[%s1344_s16 + $0x398] sm:$0xff] %v640_v18  ;;  %794 = vst [vmem:[%s1344_s16 + $0x298] sm:$0xff] %v608_v19 }
 0x1e1   : > { %v641_v20 = vpop.trf.xlu1  ;;  %v609_v21 = vpop.trf.xlu0 }
 0x1e2   : > { %828 = vst [vmem:[%s1344_s16 + $0x3a8] sm:$0xff] %v641_v20  ;;  %796 = vst [vmem:[%s1344_s16 + $0x2a8] sm:$0xff] %v609_v21 }
 0x1e5   : > { %v642_v22 = vpop.trf.xlu1  ;;  %v610_v23 = vpop.trf.xlu0 }
 0x1e6   : > { %830 = vst [vmem:[%s1344_s16 + $0x3b8] sm:$0xff] %v642_v22  ;;  %798 = vst [vmem:[%s1344_s16 + $0x2b8] sm:$0xff] %v610_v23 }
 0x1e9   : > { %v643_v24 = vpop.trf.xlu1  ;;  %v611_v25 = vpop.trf.xlu0 }
 0x1ea   : > { %832 = vst [vmem:[%s1344_s16 + $0x3c8] sm:$0xff] %v643_v24  ;;  %800 = vst [vmem:[%s1344_s16 + $0x2c8] sm:$0xff] %v611_v25 }
 0x1ed   : > { %v644_v26 = vpop.trf.xlu1  ;;  %v612_v27 = vpop.trf.xlu0 }
 0x1ee   : > { %834 = vst [vmem:[%s1344_s16 + $0x3d8] sm:$0xff] %v644_v26  ;;  %802 = vst [vmem:[%s1344_s16 + $0x2d8] sm:$0xff] %v612_v27 }
 0x1f1   : > { %v645_v28 = vpop.trf.xlu1  ;;  %v613_v29 = vpop.trf.xlu0 }
 0x1f2   : > { %836 = vst [vmem:[%s1344_s16 + $0x3e8] sm:$0xff] %v645_v28  ;;  %804 = vst [vmem:[%s1344_s16 + $0x2e8] sm:$0xff] %v613_v29 }
 0x1f5   : > { %v646_v30 = vpop.trf.xlu1  ;;  %v614_v31 = vpop.trf.xlu0 }
 0x1f6   : > { %838 = vst [vmem:[%s1344_s16 + $0x3f8] sm:$0xff] %v646_v30  ;;  %806 = vst [vmem:[%s1344_s16 + $0x2f8] sm:$0xff] %v614_v31 }
 0x1f9   : > { %v695_v32 = vpop.trf.xlu1  ;;  %v663_v33 = vpop.trf.xlu0 }
 0x1fa   : > { %872 = vst [vmem:[%s1344_s16 + $0x508] sm:$0xff] %v695_v32  ;;  %840 = vst [vmem:[%s1344_s16 + $0x408] sm:$0xff] %v663_v33 }
 0x1fd   : > { %v696_v34 = vpop.trf.xlu1  ;;  %v664_v35 = vpop.trf.xlu0 }
 0x1fe   : > { %874 = vst [vmem:[%s1344_s16 + $0x518] sm:$0xff] %v696_v34  ;;  %842 = vst [vmem:[%s1344_s16 + $0x418] sm:$0xff] %v664_v35 }
 0x201   : > { %v697_v36 = vpop.trf.xlu1  ;;  %v665_v37 = vpop.trf.xlu0 }
 0x202   : > { %876 = vst [vmem:[%s1344_s16 + $0x528] sm:$0xff] %v697_v36  ;;  %844 = vst [vmem:[%s1344_s16 + $0x428] sm:$0xff] %v665_v37 }
 0x205   : > { %v698_v38 = vpop.trf.xlu1  ;;  %v666_v39 = vpop.trf.xlu0 }
 0x206   : > { %878 = vst [vmem:[%s1344_s16 + $0x538] sm:$0xff] %v698_v38  ;;  %846 = vst [vmem:[%s1344_s16 + $0x438] sm:$0xff] %v666_v39 }
 0x209   : > { %v699_v40 = vpop.trf.xlu1  ;;  %v667_v41 = vpop.trf.xlu0 }
 0x20a   : > { %880 = vst [vmem:[%s1344_s16 + $0x548] sm:$0xff] %v699_v40  ;;  %848 = vst [vmem:[%s1344_s16 + $0x448] sm:$0xff] %v667_v41 }
 0x20d   : > { %v700_v42 = vpop.trf.xlu1  ;;  %v668_v43 = vpop.trf.xlu0 }
 0x20e   : > { %882 = vst [vmem:[%s1344_s16 + $0x558] sm:$0xff] %v700_v42  ;;  %850 = vst [vmem:[%s1344_s16 + $0x458] sm:$0xff] %v668_v43 }
 0x211   : > { %v701_v44 = vpop.trf.xlu1  ;;  %v669_v45 = vpop.trf.xlu0 }
 0x212   : > { %884 = vst [vmem:[%s1344_s16 + $0x568] sm:$0xff] %v701_v44  ;;  %852 = vst [vmem:[%s1344_s16 + $0x468] sm:$0xff] %v669_v45 }
 0x215   : > { %v702_v46 = vpop.trf.xlu1  ;;  %v670_v47 = vpop.trf.xlu0 }
 0x216   : > { %886 = vst [vmem:[%s1344_s16 + $0x578] sm:$0xff] %v702_v46  ;;  %854 = vst [vmem:[%s1344_s16 + $0x478] sm:$0xff] %v670_v47 }
 0x219   : > { %v703_v48 = vpop.trf.xlu1  ;;  %v671_v49 = vpop.trf.xlu0 }
 0x21a   : > { %888 = vst [vmem:[%s1344_s16 + $0x588] sm:$0xff] %v703_v48  ;;  %856 = vst [vmem:[%s1344_s16 + $0x488] sm:$0xff] %v671_v49 }
 0x21d   : > { %v704_v50 = vpop.trf.xlu1  ;;  %v672_v51 = vpop.trf.xlu0 }
 0x21e   : > { %890 = vst [vmem:[%s1344_s16 + $0x598] sm:$0xff] %v704_v50  ;;  %858 = vst [vmem:[%s1344_s16 + $0x498] sm:$0xff] %v672_v51 }
 0x221   : > { %v705_v52 = vpop.trf.xlu1  ;;  %v673_v53 = vpop.trf.xlu0 }
 0x222   : > { %892 = vst [vmem:[%s1344_s16 + $0x5a8] sm:$0xff] %v705_v52  ;;  %860 = vst [vmem:[%s1344_s16 + $0x4a8] sm:$0xff] %v673_v53 }
 0x225   : > { %v706_v54 = vpop.trf.xlu1  ;;  %v674_v55 = vpop.trf.xlu0 }
 0x226   : > { %894 = vst [vmem:[%s1344_s16 + $0x5b8] sm:$0xff] %v706_v54  ;;  %862 = vst [vmem:[%s1344_s16 + $0x4b8] sm:$0xff] %v674_v55 }
 0x229   : > { %v707_v56 = vpop.trf.xlu1  ;;  %v675_v57 = vpop.trf.xlu0 }
 0x22a   : > { %896 = vst [vmem:[%s1344_s16 + $0x5c8] sm:$0xff] %v707_v56  ;;  %864 = vst [vmem:[%s1344_s16 + $0x4c8] sm:$0xff] %v675_v57 }
 0x22d   : > { %v708_v58 = vpop.trf.xlu1  ;;  %v676_v59 = vpop.trf.xlu0 }
 0x22e   : > { %898 = vst [vmem:[%s1344_s16 + $0x5d8] sm:$0xff] %v708_v58  ;;  %866 = vst [vmem:[%s1344_s16 + $0x4d8] sm:$0xff] %v676_v59 }
 0x231   : > { %v709_v60 = vpop.trf.xlu1  ;;  %v677_v61 = vpop.trf.xlu0 }
 0x232   : > { %900 = vst [vmem:[%s1344_s16 + $0x5e8] sm:$0xff] %v709_v60  ;;  %868 = vst [vmem:[%s1344_s16 + $0x4e8] sm:$0xff] %v677_v61 }
 0x235   : > { %v710_v62 = vpop.trf.xlu1  ;;  %v678_v63 = vpop.trf.xlu0 }
 0x236   : > { %902 = vst [vmem:[%s1344_s16 + $0x5f8] sm:$0xff] %v710_v62  ;;  %870 = vst [vmem:[%s1344_s16 + $0x4f8] sm:$0xff] %v678_v63 }
 0x237   : > { %1095 = shalt.err (!%p1092_p2)
}
 0x238   : > { %s1096_s11 = scalar_lea.hbm %s1667_s30, 24576  ;;  %s1100_s19 = scalar_lea.hbm %s1716_s1, 49152 }
 0x239   : > { %p1097_p4 = scmp.ne.s32.totalorder %s1667_s30, %s1096_s11  ;;  %p1101_p9 = scmp.lt.u32.totalorder %s1667_s30, %s1716_s1 }
 0x23a   : > { %p1102_p1 = scmp.lt.u32.totalorder %s1100_s19, %s1096_s11  ;;  %p1104_p6 = scmp.lt.u32.totalorder %s1096_s11, %s1667_s30 }
 0x23b   : > { %p1098_p5 = pnand %p1097_p4, %p1722_p11 }
 0x23c   : > { %p1103_p3 = por %p1102_p1, %p1101_p9 }
 0x23d   : > { %p1099_p7 = pneg %p1098_p5 }
 0x23e   : > { %p1105_p12 = por %p1104_p6, %p1103_p3 }
 0x240   : > { %p1106_p13 = pnand %p1105_p12, %p1099_p7 }
 0x242   : > { %1109 = shalt.err (!%p1106_p13)
}
 0x243   : > { %s1154_s23 = smov 256   ;;  %s1155_s26 = smov 16  }
 0x244   : > { %1004 = dma.vmem_to_hbm [thread:$0]  (%p1722_p11), %s1669_s25, 24576, %s1667_s30, %s904_s10, %s1154_s23, %s1154_s23, %s1155_s26  }
 0x245 PF: > { %s932_s29 = sand.u32 1, %s1136_s6   ;;  %p1723_p8 = scmp.ne.s32.totalorder %s1720_s18, 0 }
 0x246   : > { %p1724_p10 = scmp.ge.s32.totalorder %s1148_s9, 2  ;;  %s933_s16 = scalar_lea.sflag [#allocation4], %s932_s29 }
 0x248   : > { %p1011_p0 = pnand %p1724_p10, %p1723_p8 }
 0x24a   : > { %1131 = dma.done.wait (!%p1011_p0), %s933_s16, 24576  }
 0x24b   : > { %1133 = vsyncadd (!%p1011_p0), %s933_s16, 4294942720  ;;  %p14_p2 = scmp.ge.s32.totalorder %s1191_s12, 4   ;;  %s1725_s6 = smov %s1140_s7 }
 0x24c   : > { %s1726_s7 = smov %s1144_s8  ;;  %s1727_s8 = smov %s1203_s15 }
 0x24d   : > { %s1728_s9 = smov %s1191_s12  ;;  %16 = sbr.rel (!%p14_p2) target bundleno = 5 (0x5), region = 69 }
 0x254   :  { %938 = vsyncpa [#allocation3], 1 }
 0x255   :  { %940 = vsyncpa [#allocation3 + $0x1], 1 }
 0x256   :  { %941 = vsyncpa [#allocation4], 1 }
 0x257   :  { %943 = vsyncpa [#allocation4 + $0x1], 1 }

</bundles_post_ra>
